<compile_context>
chip_gen: v5e
topology: v5e:2x2
jax: 0.10.0
libtpu: 0.0.40
codegen_flags: <defaults>
</compile_context>

<pallas_src>
import functools

import jax
import jax.numpy as jnp
from jax.experimental import pallas as pl
from jax.experimental.pallas import tpu as pltpu


def _round_up(x, m):
    return ((x + m - 1) // m) * m


def _contrastive_loss_kernel(scores_ref, diag_col_ref, diag_row_ref, col_bias_ref,
                             out_ref, *, margin, inv_temperature, true_b, tq,
                             apply_col_bias, mask_rows):
    i = pl.program_id(0)

    @pl.when(i == 0)
    def _init():
        out_ref[...] = jnp.zeros_like(out_ref)

    s = scores_ref[...].astype(jnp.float32)        # (TQ, Bp)
    d_col = diag_col_ref[...].astype(jnp.float32)  # (TQ, 1)  -> diag for these rows
    d_row = diag_row_ref[...].astype(jnp.float32)  # (1, Bp)  -> full diagonal

    if margin != 0.0:
        s = s + jnp.float32(margin)

    cost_s = jnp.maximum(s - d_col, 0.0)           # caption-retrieval cost rows
    cost_im = jnp.maximum(s - d_row, 0.0)          # image-retrieval cost rows

    if margin != 0.0:
        # relu leaves `margin` on the diagonal; replicate masked_fill_(I, 0).
        row_ids = i * tq + jax.lax.broadcasted_iota(jnp.int32, cost_s.shape, 0)
        col_ids = jax.lax.broadcasted_iota(jnp.int32, cost_s.shape, 1)
        diag_mask = row_ids == col_ids
        cost_s = jnp.where(diag_mask, 0.0, cost_s)
        cost_im = jnp.where(diag_mask, 0.0, cost_im)

    inv_t = jnp.float32(inv_temperature)
    cost_s = cost_s * inv_t
    cost_im = cost_im * inv_t

    if apply_col_bias:
        bias = col_bias_ref[...]                   # 0 for valid cols, -1e30 for padding
        cost_s = cost_s + bias
        cost_im = cost_im + bias

    def _lse(x):                                   # row-wise logsumexp, (TQ, 1)
        m = jnp.max(x, axis=1, keepdims=True)
        return m + jnp.log(jnp.sum(jnp.exp(x - m), axis=1, keepdims=True))

    lse_sum = _lse(cost_s) + _lse(cost_im)         # (TQ, 1)

    if mask_rows:
        row_ids = i * tq + jax.lax.broadcasted_iota(jnp.int32, lse_sum.shape, 0)
        lse_sum = jnp.where(row_ids < true_b, lse_sum, 0.0)

    # loss = (CE(cost_im) + CE(cost_s)) / 2 = sum_rows(lse) / (2 * B)
    out_ref[...] += jnp.sum(lse_sum, axis=0, keepdims=True) * jnp.float32(0.5 / true_b)


def contrastive_loss(scores, *, margin=0.0, temperature=0.05):
    """Pallas equivalent of ContrastiveLoss.forward (max_violation=False)."""
    B = scores.shape[0]
    assert scores.ndim == 2 and scores.shape == (B, B), "scores must be [B, B]"
    itemsize = jnp.dtype(scores.dtype).itemsize

    # Tiny side input: the diagonal (avoids in-kernel B x B masked reductions).
    diag = jnp.diagonal(scores)                    # (B,)

    # Lane-dense column padding only when B < 128.
    Bp = 128 if B < 128 else B

    # Row-tile size: multiple of 8, double-buffered tile bounded to ~8 MiB so it
    # fits comfortably inside v5e/v6e/v7x scoped VMEM defaults.
    R0 = _round_up(B, 8)
    TQ = 8
    for cand in (512, 256, 128, 64, 32, 16, 8):
        if cand <= R0 and 2 * cand * Bp * itemsize <= 8 * 1024 * 1024:
            TQ = cand
            break
    R = _round_up(B, TQ)

    pad_r, pad_c = R - B, Bp - B
    scores_p = scores
    if pad_r or pad_c:
        scores_p = jnp.pad(scores, ((0, pad_r), (0, pad_c)))
    diag_col = diag.reshape(B, 1)
    if pad_r:
        diag_col = jnp.pad(diag_col, ((0, pad_r), (0, 0)))
    diag_row = diag.reshape(1, B)
    if pad_c:
        diag_row = jnp.pad(diag_row, ((0, 0), (0, pad_c)))

    # Additive mask for padded columns (excluded from the logsumexp).
    col_bias = jnp.where(jnp.arange(Bp) < B, 0.0, -1e30).astype(jnp.float32).reshape(1, Bp)

    kernel = functools.partial(
        _contrastive_loss_kernel,
        margin=float(margin),
        inv_temperature=1.0 / float(temperature),
        true_b=B,
        tq=TQ,
        apply_col_bias=(pad_c > 0),
        mask_rows=(R != B),
    )

    out = pl.pallas_call(
        kernel,
        out_shape=jax.ShapeDtypeStruct((1, 1), jnp.float32),
        grid=(R // TQ,),
        in_specs=[
            pl.BlockSpec((TQ, Bp), lambda i: (i, 0)),   # scores row block
            pl.BlockSpec((TQ, 1), lambda i: (i, 0)),    # diag for these rows
            pl.BlockSpec((1, Bp), lambda i: (0, 0)),    # full diagonal (resident)
            pl.BlockSpec((1, Bp), lambda i: (0, 0)),    # column-pad bias (resident)
        ],
        out_specs=pl.BlockSpec((1, 1), lambda i: (0, 0)),  # resident accumulator
        compiler_params=pltpu.CompilerParams(dimension_semantics=("arbitrary",)),
        cost_estimate=pl.CostEstimate(
            flops=12 * B * B,
            transcendentals=2 * B * B,
            bytes_accessed=B * B * itemsize,
        ),
    )(scores_p, diag_col, diag_row, col_bias)
    return out[0, 0]


def _reference_loss(scores, margin=0.0, temperature=0.05):
    """Plain-JAX reference mirroring the PyTorch forward (max_violation=False)."""
    B = scores.shape[0]
    diag = jnp.diag(scores).reshape(B, 1)
    cost_s = jnp.maximum(margin + scores - diag, 0.0)
    cost_im = jnp.maximum(margin + scores - diag.T, 0.0)
    eye = jnp.eye(B, dtype=bool)
    cost_s = jnp.where(eye, 0.0, cost_s) / temperature
    cost_im = jnp.where(eye, 0.0, cost_im) / temperature

    def ce(logits):
        logp = jax.nn.log_softmax(logits, axis=1)
        return -jnp.mean(logp[jnp.arange(B), jnp.arange(B)])

    return (ce(cost_im) + ce(cost_s)) / 2.0


if __name__ == "__main__":
    B = 8  # small batch of paired (image, caption) scores
    key = jax.random.PRNGKey(0)
    scores = jax.random.normal(key, (B, B), dtype=jnp.float32)

    loss = contrastive_loss(scores)
    loss = jax.block_until_ready(loss)

    ref = _reference_loss(scores)
    assert jnp.allclose(loss, ref, atol=1e-5, rtol=1e-5), (loss, ref)

    print("KERNEL_OK")
</pallas_src>

<mosaic_0001>
module attributes {stable_mosaic.version = 11 : i64} {
  func.func @_contrastive_loss_kernel(%arg0: i32, %arg1: memref<8x128xf32, #tpu.memory_space<vmem>>, %arg2: memref<8x1xf32, #tpu.memory_space<vmem>>, %arg3: memref<1x128xf32, #tpu.memory_space<vmem>>, %arg4: memref<1x128xf32, #tpu.memory_space<vmem>>, %arg5: memref<1x1xf32, #tpu.memory_space<vmem>>) attributes {dimension_semantics = [#tpu.dimension_semantics<arbitrary>], iteration_bounds = array<i64: 1>, scalar_prefetch = 0 : i64, scratch_operands = 0 : i64, tpu.core_type = #tpu.core_type<tc>, window_params = [{transform_indices = @transform_0, window_bounds = array<i64: 8, 128>}, {transform_indices = @transform_1, window_bounds = array<i64: 8, 1>}, {pipeline_mode = #tpu.pipeline_mode<synchronous>, transform_indices = @transform_2, window_bounds = array<i64: 1, 128>}, {pipeline_mode = #tpu.pipeline_mode<synchronous>, transform_indices = @transform_3, window_bounds = array<i64: 1, 128>}, {pipeline_mode = #tpu.pipeline_mode<synchronous>, transform_indices = @transform_4, window_bounds = array<i64: 1, 1>}]} {
    %c0_i32 = arith.constant 0 : i32
    %0 = arith.cmpi eq, %arg0, %c0_i32 : i32
    %1 = arith.extui %0 : i1 to i32
    %c0_i32_0 = arith.constant 0 : i32
    %2 = arith.cmpi ne, %1, %c0_i32_0 : i32
    scf.if %2 {
      %cst_21 = arith.constant 0.000000e+00 : f32
      %49 = vector.broadcast %cst_21 : f32 to vector<1x1xf32>
      %c0_22 = arith.constant 0 : index
      %c0_23 = arith.constant 0 : index
      %50 = vector.load %arg5[%c0_22, %c0_23] : memref<1x1xf32, #tpu.memory_space<vmem>>, vector<1x1xf32>
      tpu.vector_store %arg5[%c0_22, %c0_23], %49 {strides = array<i32>} : memref<1x1xf32, #tpu.memory_space<vmem>>, vector<1x1xf32>,
    } else {
    }
    %c0 = arith.constant 0 : index
    %c0_1 = arith.constant 0 : index
    %3 = vector.load %arg1[%c0, %c0_1] : memref<8x128xf32, #tpu.memory_space<vmem>>, vector<8x128xf32>
    %c0_2 = arith.constant 0 : index
    %c0_3 = arith.constant 0 : index
    %4 = vector.load %arg2[%c0_2, %c0_3] : memref<8x1xf32, #tpu.memory_space<vmem>>, vector<8x1xf32>
    %c0_4 = arith.constant 0 : index
    %c0_5 = arith.constant 0 : index
    %5 = vector.load %arg3[%c0_4, %c0_5] : memref<1x128xf32, #tpu.memory_space<vmem>>, vector<1x128xf32>
    %6 = vector.broadcast %4 : vector<8x1xf32> to vector<8x128xf32>
    %7 = arith.subf %3, %6 : vector<8x128xf32>
    %cst = arith.constant 0.000000e+00 : f32
    %8 = vector.broadcast %cst : f32 to vector<8x128xf32>
    %9 = arith.maximumf %7, %8 : vector<8x128xf32>
    %10 = vector.broadcast %5 : vector<1x128xf32> to vector<8x128xf32>
    %11 = arith.subf %3, %10 : vector<8x128xf32>
    %cst_6 = arith.constant 0.000000e+00 : f32
    %12 = vector.broadcast %cst_6 : f32 to vector<8x128xf32>
    %13 = arith.maximumf %11, %12 : vector<8x128xf32>
    %cst_7 = arith.constant 2.000000e+01 : f32
    %14 = vector.broadcast %cst_7 : f32 to vector<8x128xf32>
    %15 = arith.mulf %9, %14 : vector<8x128xf32>
    %cst_8 = arith.constant 2.000000e+01 : f32
    %16 = vector.broadcast %cst_8 : f32 to vector<8x128xf32>
    %17 = arith.mulf %13, %16 : vector<8x128xf32>
    %c0_9 = arith.constant 0 : index
    %c0_10 = arith.constant 0 : index
    %18 = vector.load %arg4[%c0_9, %c0_10] : memref<1x128xf32, #tpu.memory_space<vmem>>, vector<1x128xf32>
    %19 = vector.broadcast %18 : vector<1x128xf32> to vector<8x128xf32>
    %20 = arith.addf %15, %19 : vector<8x128xf32>
    %21 = vector.broadcast %18 : vector<1x128xf32> to vector<8x128xf32>
    %22 = arith.addf %17, %21 : vector<8x128xf32>
    %cst_11 = arith.constant dense<0xFF800000> : vector<8xf32>
    %23 = vector.multi_reduction <maximumf>, %20, %cst_11 [1] : vector<8x128xf32> to vector<8xf32>
    %24 = vector.shape_cast %23 : vector<8xf32> to vector<8x1xf32>
    %25 = vector.broadcast %24 : vector<8x1xf32> to vector<8x128xf32>
    %26 = arith.subf %20, %25 : vector<8x128xf32>
    %27 = math.exp %26 : vector<8x128xf32>
    %cst_12 = arith.constant dense<0.000000e+00> : vector<8xf32>
    %28 = vector.multi_reduction <add>, %27, %cst_12 [1] : vector<8x128xf32> to vector<8xf32>
    %29 = vector.shape_cast %28 : vector<8xf32> to vector<8x1xf32>
    %30 = math.log %29 : vector<8x1xf32>
    %31 = arith.addf %24, %30 : vector<8x1xf32>
    %cst_13 = arith.constant dense<0xFF800000> : vector<8xf32>
    %32 = vector.multi_reduction <maximumf>, %22, %cst_13 [1] : vector<8x128xf32> to vector<8xf32>
    %33 = vector.shape_cast %32 : vector<8xf32> to vector<8x1xf32>
    %34 = vector.broadcast %33 : vector<8x1xf32> to vector<8x128xf32>
    %35 = arith.subf %22, %34 : vector<8x128xf32>
    %36 = math.exp %35 : vector<8x128xf32>
    %cst_14 = arith.constant dense<0.000000e+00> : vector<8xf32>
    %37 = vector.multi_reduction <add>, %36, %cst_14 [1] : vector<8x128xf32> to vector<8xf32>
    %38 = vector.shape_cast %37 : vector<8xf32> to vector<8x1xf32>
    %39 = math.log %38 : vector<8x1xf32>
    %40 = arith.addf %33, %39 : vector<8x1xf32>
    %41 = arith.addf %31, %40 : vector<8x1xf32>
    %c0_15 = arith.constant 0 : index
    %c0_16 = arith.constant 0 : index
    %42 = vector.load %arg5[%c0_15, %c0_16] : memref<1x1xf32, #tpu.memory_space<vmem>>, vector<1x1xf32>
    %cst_17 = arith.constant dense<0.000000e+00> : vector<1xf32>
    %43 = vector.multi_reduction <add>, %41, %cst_17 [0] : vector<8x1xf32> to vector<1xf32>
    %44 = vector.shape_cast %43 : vector<1xf32> to vector<1x1xf32>
    %cst_18 = arith.constant 6.250000e-02 : f32
    %45 = vector.broadcast %cst_18 : f32 to vector<1x1xf32>
    %46 = arith.mulf %44, %45 : vector<1x1xf32>
    %47 = arith.addf %42, %46 : vector<1x1xf32>
    %c0_19 = arith.constant 0 : index
    %c0_20 = arith.constant 0 : index
    %48 = vector.load %arg5[%c0_19, %c0_20] : memref<1x1xf32, #tpu.memory_space<vmem>>, vector<1x1xf32>
    tpu.vector_store %arg5[%c0_19, %c0_20], %47 {strides = array<i32>} : memref<1x1xf32, #tpu.memory_space<vmem>>, vector<1x1xf32>,
    return
  }
  func.func @transform_0(%arg0: i32) -> (i32, i32) {
    %c0_i32 = arith.constant 0 : i32
    %c0_i32_0 = arith.constant 0 : i32
    return %arg0, %c0_i32 : i32, i32
  }
  func.func @transform_1(%arg0: i32) -> (i32, i32) {
    %c0_i32 = arith.constant 0 : i32
    %c0_i32_0 = arith.constant 0 : i32
    return %arg0, %c0_i32 : i32, i32
  }
  func.func @transform_2(%arg0: i32) -> (i32, i32) {
    %c0_i32 = arith.constant 0 : i32
    %c0_i32_0 = arith.constant 0 : i32
    %c0_i32_1 = arith.constant 0 : i32
    return %c0_i32, %c0_i32_0 : i32, i32
  }
  func.func @transform_3(%arg0: i32) -> (i32, i32) {
    %c0_i32 = arith.constant 0 : i32
    %c0_i32_0 = arith.constant 0 : i32
    %c0_i32_1 = arith.constant 0 : i32
    return %c0_i32, %c0_i32_0 : i32, i32
  }
  func.func @transform_4(%arg0: i32) -> (i32, i32) {
    %c0_i32 = arith.constant 0 : i32
    %c0_i32_0 = arith.constant 0 : i32
    %c0_i32_1 = arith.constant 0 : i32
    return %c0_i32, %c0_i32_0 : i32, i32
  }
}

</mosaic_0001>

<bundles_post_ra>
// kernel: tpu_custom_call.1
= control target key start
LH: loop header
LB: loop body
LE: loop exit
PB: predicated region body
PF: predicated region fallthrough
CT: control target
= control target key end

     0   :  { %v135_v2 = vmov 0   ;;  %s180_s0 = inlined_call_operand.vmem [shape: f32[8,128], index: 0, kind: input, shape index: {}]   ;;  %s181_s1 = inlined_call_operand.vmem [shape: f32[8,1], index: 1, kind: input, shape index: {}]   ;;  %s182_s2 = inlined_call_operand.vmem [shape: f32[1,128], index: 2, kind: input, shape index: {}]   ;;  %s183_s3 = inlined_call_operand.vmem [shape: f32[1,128], index: 3, kind: input, shape index: {}]   ;;  %s184_s4 = inlined_call_operand.hbm [shape: f32[1,1], index: 4, kind: output, shape index: {}]  }
   0x1   :  { %v25_v0 = vld [vmem:[%s181_s1] sm:$0xff]  ;;  %98 = vset.pattern.permute.xlu0 %v135_v2 }
   0x2   :  { %v24_v1 = vld [vmem:[%s180_s0] sm:$0xff]  ;;  %29 = vperm.xlu0 %98, %v25_v0  }
   0x3   :  { %v99_v3 = vld [vmem:[%s182_s2] ss:$0 sm:$0xff] }
   0x4   :  { %9 = vsyncpa [#allocation3], 0  ;;  %v37_v4 = vsub.f32 %v24_v1, %v99_v3  ;;  %v100_v6 = vld [vmem:[%s183_s3] ss:$0 sm:$0xff]  ;;  %vm22_vm0 = vcmask 0   ;;  %v136_v22 = vmov 0.0  }
   0x5   :  { %23 = vst.msk [vmem:[#allocation2] sm:$0x1] %vm22_vm0, %v136_v22  ;;  %s137_s0 = smov [#allocation2]   ;;  %s86_s23 = sshll.u32 %s184_s4, 4  ;;  %s87_s23 = int_to_ptr.hbm [resolvable:$true] %s86_s23 }
   0x6   :  { %v38_v5 = vmax.f32 %v37_v4, 0.0  ;;  %s84_s1 = sshll.u32 %s137_s0, 4  ;;  %s85_s1 = int_to_ptr.vmem [resolvable:$true] %s84_s1 }
   0x8   :  { %v40_v7 = vmul.f32 20.0, %v38_v5 }
   0xa   :  { %v46_v8 = vadd.f32 %v100_v6, %v40_v7 }
   0xc   :  { %57 = vmax.xlane.f32.xlu1 %v46_v8  ;;  %v68_v38 = vld [vmem:[#allocation2] sm:$0x1] }
  0x74   :  { %v30_v9 = vpop.permute.xlu0 %29 }
  0x75   :  { %v32_v10 = vsub.f32 %v24_v1, %v30_v9 }
  0x77   :  { %v33_v11 = vmax.f32 %v32_v10, 0.0 }
  0x79   :  { %v39_v12 = vmul.f32 20.0, %v33_v11 }
  0x7b   :  { %v45_v13 = vadd.f32 %v100_v6, %v39_v12 }
  0x7d   :  { %47 = vmax.xlane.f32.xlu0 %v45_v13 }
  0x7f   :  { %v58_v14 = vpop.xlane.xlu1 %57 }
  0x80   :  { %v59_v15 = vsub.f32 %v46_v8, %v58_v14 }
  0x82   :  { %v60_v16 = vmul.f32 1.442695, %v59_v15 }
  0x84   :  { %101 = vpow2.f32 %v60_v16 }
  0x8a   :  { %v102_v17 = vpop.eup %101 }
  0x8b   :  { %62 = vadd.xlane.f32.xlu2 %v102_v17 }
  0xf0   :  { %v48_v18 = vpop.xlane.xlu0 %47 }
  0xf1   :  { %v49_v19 = vsub.f32 %v45_v13, %v48_v18 }
  0xf3   :  { %v50_v20 = vmul.f32 1.442695, %v49_v19 }
  0xf5   :  { %103 = vpow2.f32 %v50_v20 }
  0xfb   :  { %v104_v21 = vpop.eup %103 }
  0xfc   :  { %52 = vadd.xlane.f32.xlu1 %v104_v21 }
  0xfe   :  { %v63_v23 = vpop.xlane.xlu2 %62 }
  0xff   :  { %105 = vlog2.f32 %v63_v23 }
 0x105   :  { %v106_v25 = vpop.eup %105 }
 0x106   :  { %v65_v26 = vmul.f32 0.6931472, %v106_v25 }
 0x108   :  { %v66_v29 = vadd.f32 %v65_v26, %v58_v14 }
 0x16f   :  { %v53_v24 = vpop.xlane.xlu1 %52 }
 0x170   :  { %107 = vlog2.f32 %v53_v24 }
 0x176   :  { %v108_v27 = vpop.eup %107 }
 0x177   :  { %v55_v28 = vmul.f32 0.6931472, %v108_v27 }
 0x179   :  { %v56_v30 = vadd.f32 %v55_v28, %v48_v18 }
 0x17b   :  { %v67_v31 = vadd.f32 %v66_v29, %v56_v30 }
 0x17d   :  { %v69_v32 = vrot.slane %v67_v31, 4 }
 0x17f   :  { %v70_v33 = vadd.f32 %v69_v32, %v67_v31 }
 0x181   :  { %v71_v34 = vrot.slane %v70_v33, 2 }
 0x183   :  { %v72_v35 = vadd.f32 %v71_v34, %v70_v33 }
 0x185   :  { %v73_v36 = vrot.slane %v72_v35, 1 }
 0x187   :  { %v74_v37 = vadd.f32 %v73_v36, %v72_v35 }
 0x189   :  { %v75_v39 = vmul.f32 0.0625, %v74_v37 }
 0x18b   :  { %v76_v40 = vadd.f32 %v75_v39, %v68_v38 }
 0x18d   :  { %78 = vst.msk [vmem:[#allocation2] sm:$0x1] %vm22_vm0, %v76_v40 }
 0x18e   :  { %89 = dma.vmem_to_hbm [thread:$0]  %s85_s1, 16, %s87_s23, [#allocation3]  }
 0x18f   :  { %133 = dma.done.wait [#allocation3], 16  }
 0x190   :  { %134 = vsyncadd [#allocation3], 4294967280 }
 0x191   :  { %94 = vsyncpa [#allocation3], 1 }

</bundles_post_ra>
